<compile_context>
chip_gen: v5e
topology: v5e:2x2
jax: 0.10.0
libtpu: 0.0.40
codegen_flags: <defaults>
</compile_context>

<pallas_src>
import functools

import numpy as np

import jax
import jax.numpy as jnp
from jax.experimental import pallas as pl
from jax.experimental.pallas import tpu as pltpu

EPS = 1e-5
LANE = 128
SUBLANE = 8


def _round_up(x, m):
    return (x + m - 1) // m * m


def _cdiv(a, b):
    return -(-a // b)


@functools.lru_cache(maxsize=1)
def _vmem_config():
    """Returns (tile_budget_bytes, vmem_limit_bytes) sized per TPU generation."""
    phys = None
    try:
        info = pltpu.get_tpu_info()
        phys = getattr(info, "vmem_capacity_bytes", None)
    except Exception:
        phys = None
    if isinstance(phys, int) and phys >= 100 * 1024 * 1024:
        # v5e / v6e: 128 MiB physical VMEM -> bigger blocks, fewer grid steps.
        return 48 * 1024 * 1024, 80 * 1024 * 1024
    # v7x-class (64 MiB physical per core) or unknown: stay conservative.
    return 20 * 1024 * 1024, 32 * 1024 * 1024


def _transition_kernel(x_ref, scale_ref, shift_ref, w_ref, o_ref):
    # x_ref:     (TB, 2, Wo_pad, C2) bf16   axis 1 = h-parity, last dim packs
    #                                       (w-parity, channel)
    # scale_ref: (1, C2) f32   gamma * rsqrt(var+eps), tiled over w-parity
    # shift_ref: (1, C2) f32   beta - mean*scale, tiled over w-parity
    # w_ref:     (C2, Cout_pad) bf16  = 0.25 * [W; W]  (pool factor folded in)
    # o_ref:     (TB*Wo_pad, Cout_pad)
    x = x_ref[...].astype(jnp.float32)               # BN math in f32 (v5e-safe)
    c2 = x.shape[-1]
    scale = scale_ref[...].reshape(1, 1, 1, c2)
    shift = shift_ref[...].reshape(1, 1, 1, c2)

    # BatchNorm affine + ReLU (single FMA + max on the VPU).
    z = jnp.maximum(x * scale + shift, 0.0)          # (TB, 2, Wo_pad, C2)

    # Sum the h-pair of the 2x2 pool window (cheap outer-dim add).
    z = z[:, 0, :, :] + z[:, 1, :, :]                # (TB, Wo_pad, C2)

    # w-pair sum + 1x1 conv + 0.25 pool factor fused into one MXU matmul.
    tb, wo, _ = z.shape
    # Wo_pad % 8 == 0 -> this reshape is a free tile re-interpretation (no copy).
    z2 = z.reshape(tb * wo, c2).astype(jnp.bfloat16)
    acc = jnp.dot(z2, w_ref[...], preferred_element_type=jnp.float32)
    o_ref[...] = acc.astype(o_ref.dtype)


def _choose_tile_rows(n_sr, wo_pad, c2, cout_pad, out_bytes, budget_bytes,
                      max_tile_rows=None):
    """Pick TB (pooled super-rows per tile) from a VMEM budget.

    Guarantees >= 2 grid steps (pipelining / v7x 2-TC balance) and an even step
    count when possible; never degrades TB via a divisor search — ragged tails
    are handled by a cdiv grid instead.
    """
    # bytes per super-row: double-buffered bf16 input + f32 temporaries +
    # double-buffered output block + f32 matmul accumulator (generous).
    per_row = wo_pad * (30 * c2 + cout_pad * (2 * out_bytes + 4))
    tb = max(1, min(n_sr, budget_bytes // max(per_row, 1)))
    steps = _cdiv(n_sr, tb)
    if n_sr >= 2:
        steps = max(steps, 2)            # keep the DMA pipeline / both cores busy
    if steps % 2 and steps < n_sr:
        steps += 1                       # even grid balances v7x's 2 TensorCores
    tb = _cdiv(n_sr, steps)
    if max_tile_rows is not None:
        tb = max(1, min(tb, max_tile_rows))
    return tb


@functools.partial(
    jax.jit, static_argnames=("compute_dtype", "out_dtype", "max_tile_rows"))
def transition_block_nhwc(x_nhwc, gamma, beta, conv_w, *,
                          compute_dtype=jnp.bfloat16, out_dtype=None,
                          max_tile_rows=None):
    """Core NHWC entry point: x (N,H,W,Cin) -> (N,Ho,Wo,Cout)."""
    N, H, W, Cin = x_nhwc.shape
    Cout = conv_w.shape[0]
    Ho, Wo = H // 2, W // 2          # AvgPool2d(2,2) drops a trailing odd row/col
    if out_dtype is None:
        out_dtype = x_nhwc.dtype

    # Activation feeds the kernel in bf16 (halves the dominant HBM read).
    x_k = x_nhwc if x_nhwc.dtype == compute_dtype else x_nhwc.astype(compute_dtype)

    # --- training-mode BatchNorm2d batch statistics (biased variance) in ONE
    #     fused pass: sum and sum-of-squares, f32 accumulation, var clamped.
    cnt = float(N * H * W)
    s1 = jnp.sum(x_k, axis=(0, 1, 2), dtype=jnp.float32)
    s2 = jnp.sum(jnp.square(x_k.astype(jnp.float32)), axis=(0, 1, 2))
    mean = s1 / cnt
    var = jnp.maximum(s2 / cnt - jnp.square(mean), 0.0)
    scale = gamma.astype(jnp.float32) * jax.lax.rsqrt(var + EPS)
    shift = beta.astype(jnp.float32) - mean * scale

    # Drop a trailing odd row/col AFTER the stats (matches PyTorch pool semantics).
    if H != 2 * Ho or W != 2 * Wo:
        x_k = x_k[:, :2 * Ho, :2 * Wo, :]

    # --- lane/contraction alignment: pad Cin so the packed 2*Cin is a 128 multiple.
    Cin_pad = Cin if Cin % (LANE // 2) == 0 else _round_up(Cin, LANE // 2)
    if Cin_pad != Cin:
        x_k = jnp.pad(x_k, ((0, 0), (0, 0), (0, 0), (0, Cin_pad - Cin)))
        scale = jnp.pad(scale, (0, Cin_pad - Cin))
        shift = jnp.pad(shift, (0, Cin_pad - Cin))
    C2 = 2 * Cin_pad
    scale2 = jnp.concatenate([scale, scale]).reshape(1, C2)   # [w-even | w-odd]
    shift2 = jnp.concatenate([shift, shift]).reshape(1, C2)

    # --- 1x1 conv weight: stack twice over w-parity, fold 0.25 pool factor,
    #     pad K and N to MXU/lane-friendly sizes, bf16 for full-rate MXU.
    Cout_pad = _round_up(Cout, LANE)
    w_mat = conv_w.reshape(Cout, Cin).T.astype(jnp.float32)          # (Cin, Cout)
    w_mat = jnp.pad(w_mat, ((0, Cin_pad - Cin), (0, Cout_pad - Cout)))
    w2 = (0.25 * jnp.concatenate([w_mat, w_mat], axis=0)).astype(jnp.bfloat16)

    # --- pure reshape: (N, 2Ho, 2Wo, Cin_pad) -> (N*Ho, 2, Wo, 2*Cin_pad)
    n_sr = N * Ho
    x_blk = x_k.reshape(n_sr, 2, Wo, C2)

    # Sublane-align Wo so the in-kernel (TB,Wo,C2)->(TB*Wo,C2) collapse is free.
    Wo_pad = Wo if Wo % SUBLANE == 0 else _round_up(Wo, SUBLANE)
    if Wo_pad != Wo:
        x_blk = jnp.pad(x_blk, ((0, 0), (0, 0), (0, Wo_pad - Wo), (0, 0)))

    out_bytes = np.dtype(out_dtype).itemsize
    budget, vmem_limit = _vmem_config()
    tb = _choose_tile_rows(n_sr, Wo_pad, C2, Cout_pad, out_bytes, budget,
                           max_tile_rows=max_tile_rows)
    grid = (_cdiv(n_sr, tb),)         # cdiv grid: Pallas masks any ragged tail

    Mo = n_sr * Wo_pad
    cost = pl.CostEstimate(
        flops=2 * Mo * C2 * Cout_pad + 6 * n_sr * 2 * Wo_pad * C2,
        transcendentals=0,
        bytes_accessed=(x_blk.size * x_blk.dtype.itemsize
                        + Mo * Cout_pad * out_bytes
                        + w2.size * 2 + (scale2.size + shift2.size) * 4),
    )

    out_flat = pl.pallas_call(
        _transition_kernel,
        out_shape=jax.ShapeDtypeStruct((Mo, Cout_pad), out_dtype),
        grid=grid,
        in_specs=[
            pl.BlockSpec((tb, 2, Wo_pad, C2), lambda i: (i, 0, 0, 0)),
            pl.BlockSpec((1, C2), lambda i: (0, 0)),
            pl.BlockSpec((1, C2), lambda i: (0, 0)),
            pl.BlockSpec((C2, Cout_pad), lambda i: (0, 0)),
        ],
        out_specs=pl.BlockSpec((tb * Wo_pad, Cout_pad), lambda i: (i, 0)),
        compiler_params=pltpu.CompilerParams(
            dimension_semantics=("parallel",),
            vmem_limit_bytes=vmem_limit,
        ),
        cost_estimate=cost,
    )(x_blk, scale2, shift2, w2)

    out = out_flat.reshape(N, Ho, Wo_pad, Cout_pad)
    if Wo_pad != Wo or Cout_pad != Cout:
        out = out[:, :, :Wo, :Cout]
    return out


def transition_block(x_nchw, gamma, beta, conv_w, *, compute_dtype=jnp.bfloat16,
                     out_dtype=None, max_tile_rows=None):
    """PyTorch-layout wrapper: (N,Cin,H,W) -> (N,Cout,H/2,W/2).

    The two transposes below are each a full extra HBM pass; real NHWC
    pipelines should call transition_block_nhwc directly. The bf16 cast is
    fused into the first transpose so no separate fp32 copy is materialized.
    """
    x_nhwc = jnp.transpose(x_nchw, (0, 2, 3, 1)).astype(compute_dtype)
    out_nhwc = transition_block_nhwc(
        x_nhwc, gamma, beta, conv_w, compute_dtype=compute_dtype,
        out_dtype=x_nchw.dtype if out_dtype is None else out_dtype,
        max_tile_rows=max_tile_rows)
    return jnp.transpose(out_nhwc, (0, 3, 1, 2))


def transition_block_ref(x_nchw, gamma, beta, conv_w):
    """Pure-JAX reference mirroring the PyTorch forward (training-mode BN)."""
    x = x_nchw.astype(jnp.float32)
    mean = jnp.mean(x, axis=(0, 2, 3), keepdims=True)
    var = jnp.mean((x - mean) ** 2, axis=(0, 2, 3), keepdims=True)
    xn = (x - mean) * jax.lax.rsqrt(var + EPS)
    xn = xn * gamma.reshape(1, -1, 1, 1) + beta.reshape(1, -1, 1, 1)
    xr = jnp.maximum(xn, 0.0)
    y = jnp.einsum('nchw,oc->nohw', xr,
                   conv_w.reshape(conv_w.shape[0], conv_w.shape[1]))
    N, Co, H, W = y.shape
    return jnp.mean(y.reshape(N, Co, H // 2, 2, W // 2, 2), axis=(3, 5))


if __name__ == "__main__":
    N, Cin, H, W = 2, 4, 16, 16
    Cout = 2

    key = jax.random.PRNGKey(0)
    kx, kw = jax.random.split(key)
    x = jax.random.normal(kx, (N, Cin, H, W), dtype=jnp.float32)

    # PyTorch defaults: gamma=1, beta=0; conv weight drawn deterministically.
    gamma = jnp.ones((Cin,), jnp.float32)
    beta = jnp.zeros((Cin,), jnp.float32)
    conv_w = jax.random.normal(kw, (Cout, Cin, 1, 1), dtype=jnp.float32) * 0.1

    # max_tile_rows=4 forces a 4-step grid at this toy size so the tiling /
    # index maps / pipelining are actually exercised.
    out = transition_block(x, gamma, beta, conv_w, max_tile_rows=4)
    out = jax.block_until_ready(out)

    ref = transition_block_ref(x, gamma, beta, conv_w)
    assert out.shape == (N, Cout, H // 2, W // 2), out.shape
    err = float(jnp.max(jnp.abs(out.astype(jnp.float32) - ref)))
    # bf16 activations + bf16 MXU operands (fp32 accumulation) -> loose tol.
    assert err < 2e-2, err
    print("KERNEL_OK")
</pallas_src>

<mosaic_0001>
module attributes {stable_mosaic.version = 11 : i64} {
  func.func @_transition_kernel(%arg0: i32, %arg1: memref<4x2x8x128xbf16, #tpu.memory_space<vmem>>, %arg2: memref<1x128xf32, #tpu.memory_space<vmem>>, %arg3: memref<1x128xf32, #tpu.memory_space<vmem>>, %arg4: memref<128x128xbf16, #tpu.memory_space<vmem>>, %arg5: memref<32x128xf32, #tpu.memory_space<vmem>>) attributes {dimension_semantics = [#tpu.dimension_semantics<parallel>], iteration_bounds = array<i64: 4>, scalar_prefetch = 0 : i64, scratch_operands = 0 : i64, tpu.core_type = #tpu.core_type<tc>, window_params = [{transform_indices = @transform_0, window_bounds = array<i64: 4, 2, 8, 128>}, {pipeline_mode = #tpu.pipeline_mode<synchronous>, transform_indices = @transform_1, window_bounds = array<i64: 1, 128>}, {pipeline_mode = #tpu.pipeline_mode<synchronous>, transform_indices = @transform_2, window_bounds = array<i64: 1, 128>}, {pipeline_mode = #tpu.pipeline_mode<synchronous>, transform_indices = @transform_3, window_bounds = array<i64: 128, 128>}, {transform_indices = @transform_4, window_bounds = array<i64: 32, 128>}]} {
    %c0 = arith.constant 0 : index
    %c0_0 = arith.constant 0 : index
    %c0_1 = arith.constant 0 : index
    %c0_2 = arith.constant 0 : index
    %0 = vector.load %arg1[%c0, %c0_0, %c0_1, %c0_2] : memref<4x2x8x128xbf16, #tpu.memory_space<vmem>>, vector<4x2x8x128xbf16>
    %1 = arith.extf %0 : vector<4x2x8x128xbf16> to vector<4x2x8x128xf32>
    %c0_3 = arith.constant 0 : index
    %c0_4 = arith.constant 0 : index
    %2 = vector.load %arg2[%c0_3, %c0_4] : memref<1x128xf32, #tpu.memory_space<vmem>>, vector<1x128xf32>
    %3 = vector.shape_cast %2 : vector<1x128xf32> to vector<1x1x1x128xf32>
    %c0_5 = arith.constant 0 : index
    %c0_6 = arith.constant 0 : index
    %4 = vector.load %arg3[%c0_5, %c0_6] : memref<1x128xf32, #tpu.memory_space<vmem>>, vector<1x128xf32>
    %5 = vector.shape_cast %4 : vector<1x128xf32> to vector<1x1x1x128xf32>
    %6 = vector.broadcast %3 : vector<1x1x1x128xf32> to vector<4x2x8x128xf32>
    %7 = arith.mulf %1, %6 : vector<4x2x8x128xf32>
    %8 = vector.broadcast %5 : vector<1x1x1x128xf32> to vector<4x2x8x128xf32>
    %9 = arith.addf %7, %8 : vector<4x2x8x128xf32>
    %cst = arith.constant 0.000000e+00 : f32
    %10 = vector.broadcast %cst : f32 to vector<4x2x8x128xf32>
    %11 = arith.maximumf %9, %10 : vector<4x2x8x128xf32>
    %12 = vector.extract_strided_slice %11 {offsets = [0, 0, 0, 0], sizes = [4, 1, 8, 128], strides = [1, 1, 1, 1]} : vector<4x2x8x128xf32> to vector<4x1x8x128xf32>
    %13 = vector.shape_cast %12 : vector<4x1x8x128xf32> to vector<4x8x128xf32>
    %14 = vector.extract_strided_slice %11 {offsets = [0, 1, 0, 0], sizes = [4, 1, 8, 128], strides = [1, 1, 1, 1]} : vector<4x2x8x128xf32> to vector<4x1x8x128xf32>
    %15 = vector.shape_cast %14 : vector<4x1x8x128xf32> to vector<4x8x128xf32>
    %16 = arith.addf %13, %15 : vector<4x8x128xf32>
    %17 = vector.shape_cast %16 : vector<4x8x128xf32> to vector<32x128xf32>
    %18 = arith.truncf %17 : vector<32x128xf32> to vector<32x128xbf16>
    %c0_7 = arith.constant 0 : index
    %c0_8 = arith.constant 0 : index
    %19 = vector.load %arg4[%c0_7, %c0_8] : memref<128x128xbf16, #tpu.memory_space<vmem>>, vector<128x128xbf16>
    %cst_9 = arith.constant dense<0.000000e+00> : vector<32x128xf32>
    %20 = tpu.matmul %18, %19, %cst_9 {dimension_numbers = #tpu.dot_dimension_numbers<[1], [0], [0], [1], [0, 0, 1, 1], [], []>} : vector<32x128xbf16>, vector<128x128xbf16>, vector<32x128xf32> -> vector<32x128xf32>
    %c0_10 = arith.constant 0 : index
    %c0_11 = arith.constant 0 : index
    %21 = vector.load %arg5[%c0_10, %c0_11] : memref<32x128xf32, #tpu.memory_space<vmem>>, vector<32x128xf32>
    tpu.vector_store %arg5[%c0_10, %c0_11], %20 {strides = array<i32>} : memref<32x128xf32, #tpu.memory_space<vmem>>, vector<32x128xf32>,
    return
  }
  func.func @transform_0(%arg0: i32) -> (i32, i32, i32, i32) {
    %c0_i32 = arith.constant 0 : i32
    %c0_i32_0 = arith.constant 0 : i32
    %c0_i32_1 = arith.constant 0 : i32
    %c0_i32_2 = arith.constant 0 : i32
    return %arg0, %c0_i32, %c0_i32_0, %c0_i32_1 : i32, i32, i32, i32
  }
  func.func @transform_1(%arg0: i32) -> (i32, i32) {
    %c0_i32 = arith.constant 0 : i32
    %c0_i32_0 = arith.constant 0 : i32
    %c0_i32_1 = arith.constant 0 : i32
    return %c0_i32, %c0_i32_0 : i32, i32
  }
  func.func @transform_2(%arg0: i32) -> (i32, i32) {
    %c0_i32 = arith.constant 0 : i32
    %c0_i32_0 = arith.constant 0 : i32
    %c0_i32_1 = arith.constant 0 : i32
    return %c0_i32, %c0_i32_0 : i32, i32
  }
  func.func @transform_3(%arg0: i32) -> (i32, i32) {
    %c0_i32 = arith.constant 0 : i32
    %c0_i32_0 = arith.constant 0 : i32
    %c0_i32_1 = arith.constant 0 : i32
    return %c0_i32, %c0_i32_0 : i32, i32
  }
  func.func @transform_4(%arg0: i32) -> (i32, i32) {
    %c0_i32 = arith.constant 0 : i32
    %c0_i32_0 = arith.constant 0 : i32
    return %arg0, %c0_i32 : i32, i32
  }
}

</mosaic_0001>

<bundles_post_ra>
// kernel: transition_block_nhwc.1
= control target key start
LH: loop header
LB: loop body
LE: loop exit
PB: predicated region body
PF: predicated region fallthrough
CT: control target
= control target key end

     0   :  { %s524_s15 = smov 0   ;;  %s578_s0 = inlined_call_operand.vmem [shape: bf16[16,2,8,128], index: 0, kind: input, shape index: {}]   ;;  %s579_s1 = inlined_call_operand.vmem [shape: f32[1,128], index: 1, kind: input, shape index: {}]   ;;  %s580_s2 = inlined_call_operand.vmem [shape: f32[1,128], index: 2, kind: input, shape index: {}]   ;;  %s581_s3 = inlined_call_operand.vmem [shape: bf16[128,128], index: 3, kind: input, shape index: {}]   ;;  %s582_s4 = inlined_call_operand.vmem [shape: f32[128,128], index: 4, kind: output, shape index: {}]  }
   0x1 LB: > { %s401_s16 = sadd.s32 4294967295, %s497_s15   ;;  %p405_p0 = scmp.ge.s32.totalorder %s497_s15, 1  ;;  %s497_s15 = sphi %s524_s15, %s14_s15  }
   0x2   : > { %p164_p1 = scmp.lt.s32.totalorder %s497_s15, 5 }
   0x4   : > { %p165_p2 = pnand %p405_p0, %p164_p1 }
   0x5   : > { %s406_s19 = sshll.u32 (!%p165_p2), %s401_s16, 2 }
   0x6   : > { %168 = sbr.rel (%p165_p2) target bundleno = 179 (0xb3), region = 36  ;;  %p192_p3 = scmp.lt.s32.totalorder (!%p165_p2), %s406_s19, 15 }
   0xb   : > { %v453_v0 = vld [vmem:[%s581_s3 + $0x38] sm:$0xff]  ;;  %v452_v1 = vld [vmem:[%s581_s3 + $0x30] sm:$0xff]  ;;  %s584_s19 = smov (!%p192_p3, %s406_s19), 15  ;;  %v451_v2 = vld [vmem:[%s581_s3 + $0x28] sm:$0xff] }
   0xc   : > { %322 = vmatpush.bf16.msra.mxu0 %v453_v0  ;;  %473 = vmatpush.bf16.msra.mxu1 %v453_v0  ;;  %s445_s22 = sshll.u32 %s584_s19, 3  ;;  %v489_v10 = vld [vmem:[%s579_s1] ss:$0 sm:$0xff]  ;;  %v449_v26 = vld [vmem:[%s581_s3 + $0x18] sm:$0xff]  ;;  %v448_v35 = vld [vmem:[%s581_s3 + $0x10] sm:$0xff] }
   0xd   : > { %s196_s27 = scalar_lea.vmem %s578_s0, %s445_s22  ;;  %v450_v16 = vld [vmem:[%s581_s3 + $0x20] sm:$0xff]  ;;  %v447_v44 = vld [vmem:[%s581_s3 + $0x8] sm:$0xff]  ;;  %s202_s20 = scalar_lea.vmem %s582_s4, %s445_s22 }
   0xe   : > { %v455_v3 = vld [vmem:[%s196_s27] sm:$0xff]   ;;  %v470_v4 = vld [vmem:[%s196_s27 + $0x8] sm:$0xff]   ;;  %v471_v5 = vld [vmem:[%s196_s27 + $0x10] sm:$0xff]  }
   0xf   : > { %v456_v6 = vunpack.c.l.bf16 %v455_v3  ;;  %v457_v7 = vunpack.c.h.bf16 %v455_v3  ;;  %v460_v8 = vunpack.c.l.bf16 %v470_v4  ;;  %v461_v9 = vunpack.c.h.bf16 %v470_v4  ;;  %v472_v11 = vld [vmem:[%s196_s27 + $0x18] sm:$0xff]   ;;  %v490_v21 = vld [vmem:[%s580_s2] ss:$0 sm:$0xff] }
  0x10   : > { %323 = vmatpush.bf16.msra.mxu0 %v452_v1  ;;  %474 = vmatpush.bf16.msra.mxu1 %v452_v1  ;;  %v464_v12 = vunpack.c.l.bf16 %v471_v5  ;;  %v465_v13 = vunpack.c.h.bf16 %v471_v5  ;;  %v468_v14 = vunpack.c.l.bf16 %v472_v11  ;;  %v469_v15 = vunpack.c.h.bf16 %v472_v11  ;;  %v446_v49 = vld [vmem:[%s581_s3] sm:$0xff] }
  0x11   : > { %v225_v17 = vmul.f32 %v489_v10, %v456_v6  ;;  %v226_v18 = vmul.f32 %v489_v10, %v457_v7  ;;  %v227_v19 = vmul.f32 %v489_v10, %v460_v8  ;;  %v228_v20 = vmul.f32 %v489_v10, %v461_v9 }
  0x12   : > { %v229_v22 = vmul.f32 %v489_v10, %v464_v12  ;;  %v230_v23 = vmul.f32 %v489_v10, %v465_v13  ;;  %v231_v24 = vmul.f32 %v489_v10, %v468_v14  ;;  %v232_v25 = vmul.f32 %v489_v10, %v469_v15 }
  0x13   : > { %v236_v27 = vadd.f32 %v490_v21, %v225_v17  ;;  %v237_v28 = vadd.f32 %v490_v21, %v226_v18  ;;  %v238_v29 = vadd.f32 %v490_v21, %v227_v19  ;;  %v239_v30 = vadd.f32 %v490_v21, %v228_v20 }
  0x14   : > { %324 = vmatpush.bf16.msra.mxu0 %v451_v2  ;;  %475 = vmatpush.bf16.msra.mxu1 %v451_v2  ;;  %v240_v31 = vadd.f32 %v490_v21, %v229_v22  ;;  %v241_v32 = vadd.f32 %v490_v21, %v230_v23  ;;  %v242_v33 = vadd.f32 %v490_v21, %v231_v24 }
  0x15   : > { %v243_v34 = vadd.f32 %v490_v21, %v232_v25  ;;  %v244_v36 = vmax.f32 %v236_v27, 0.0  ;;  %v245_v37 = vmax.f32 %v237_v28, 0.0  ;;  %v246_v38 = vmax.f32 %v238_v29, 0.0 }
  0x16   : > { %v247_v39 = vmax.f32 %v239_v30, 0.0  ;;  %v248_v40 = vmax.f32 %v240_v31, 0.0  ;;  %v249_v41 = vmax.f32 %v241_v32, 0.0  ;;  %v250_v42 = vmax.f32 %v242_v33, 0.0 }
  0x17   : > { %v251_v43 = vmax.f32 %v243_v34, 0.0  ;;  %v252_v45 = vadd.f32 %v245_v37, %v244_v36 }
  0x18   : > { %325 = vmatpush.bf16.msra.mxu0 %v450_v16  ;;  %476 = vmatpush.bf16.msra.mxu1 %v450_v16  ;;  %v253_v46 = vadd.f32 %v247_v39, %v246_v38  ;;  %v254_v47 = vadd.f32 %v249_v41, %v248_v40 }
  0x19   : > { %v255_v48 = vadd.f32 %v251_v43, %v250_v42 }
  0x1a   : > { %v256_v50 = vpack.c.bf16 %v253_v46, %v252_v45 }
  0x1b   : > { %v257_v51 = vpack.c.bf16 %v255_v48, %v254_v47 }
  0x1c   : > { %326 = vmatpush.bf16.msra.mxu0 %v449_v26  ;;  %477 = vmatpush.bf16.msra.mxu1 %v449_v26 }
  0x20   : > { %327 = vmatpush.bf16.msra.mxu0 %v448_v35  ;;  %478 = vmatpush.bf16.msra.mxu1 %v448_v35 }
  0x24   : > { %328 = vmatpush.bf16.msra.mxu0 %v447_v44  ;;  %479 = vmatpush.bf16.msra.mxu1 %v447_v44 }
  0x28   : > { %329 = vmatpush.bf16.msra.mxu0 %v446_v49  ;;  %480 = vmatpush.bf16.msra.mxu1 %v446_v49 }
  0x2b   : > { %330 = vmatmul.bf16.vlgmr.msra.gmra.mxu0 %v256_v50  ;;  %335 = vmatmul.bf16.vlgmr.msra.gmra.mxu1 %v257_v51 }
  0xa8   : > { %v331_v52 = vpop.f32.mrf.mxu0  ;;  %v336_v53 = vpop.f32.mrf.mxu1 }
  0xa9   : > { %341 = vst [vmem:[%s202_s20] sm:$0xff] %v331_v52 }
  0xaa   : > { %343 = vst [vmem:[%s202_s20 + $0x10] sm:$0xff] %v336_v53 }
  0xb0   : > { %v333_v54 = vpop.f32.mrf.mxu0  ;;  %v338_v55 = vpop.f32.mrf.mxu1 }
  0xb1   : > { %342 = vst [vmem:[%s202_s20 + $0x8] sm:$0xff] %v333_v54 }
  0xb2   : > { %344 = vst [vmem:[%s202_s20 + $0x18] sm:$0xff] %v338_v55 }
  0xb3 PF: > { %s14_s15 = sadd.s32 1, %s497_s15  }
  0xb4   : > { %p11_p4 = scmp.ge.s32.totalorder %s14_s15, 6  }
  0xb6   :  { %13 = sbr.rel (!%p11_p4) target bundleno = 1 (0x1), region = 66 }

</bundles_post_ra>
